<compile_context>
chip_gen: v6e
topology: v6e:2x2x1
jax: 0.10.0
libtpu: 0.0.40
codegen_flags: <defaults>
</compile_context>

<pallas_src>
import functools

import jax
import jax.numpy as jnp
from jax.experimental import pallas as pl
from jax.experimental.pallas import tpu as pltpu


def _round_up(x, m):
    return ((x + m - 1) // m) * m


def _device_kind():
    try:
        return jax.devices()[0].device_kind.lower()
    except Exception:
        return ""


def _vmem_budget_and_block_k(kind):
    """(scoped-VMEM budget in bytes, default kv tile) per TPU generation."""
    if "v7" in kind:
        # 64 MiB physical VMEM per TensorCore on v7x; leave spill headroom.
        return 48 * (1 << 20), 256
    if "v6" in kind:
        # 128 MiB physical; 2x256^2 MXU -> 256-deep kv tiles fill it.
        return 96 * (1 << 20), 256
    # v5e (and unknown): 4x128^2 MXU gains nothing from 256-wide kv tiles;
    # spend VMEM on a deeper block_q instead.  Scoped default is only 16 MiB,
    # so the limit is always set explicitly below.
    return 64 * (1 << 20), 128


def _vmem_estimate(bb, tq, tk, d, itemsize, kv_buffers=2):
    """Rough per-core VMEM footprint for one tiling choice."""
    qo = 2 * (2 * bb * tq * d * itemsize)            # q + out, double-buffered
    kv = 2 * (kv_buffers * bb * tk * d * itemsize)   # k + v streams
    scratch = bb * tq * d * 4 + 2 * bb * tq * 4      # acc + m + l (f32)
    interm = 4 * bb * tq * tk * 4                    # s / p / exp temps (f32)
    return qo + kv + scratch + interm


def _divisor_block(s, target, gran):
    """Largest block <= target that tiles `s` exactly (s itself if s<=target)."""
    if s <= target:
        return s
    b = (target // gran) * gran
    while b >= gran:
        if s % b == 0:
            return b
        b -= gran
    return None


def _flash_attention_kernel(q_ref, k_ref, v_ref, o_ref,
                            m_scr, l_scr, acc_scr,
                            *, scale, seq_len, block_k, needs_mask,
                            approx_reciprocal):
    kv = pl.program_id(2)

    @pl.when(kv == 0)
    def _init():
        m_scr[...] = jnp.full(m_scr.shape, -jnp.inf, jnp.float32)
        l_scr[...] = jnp.zeros(l_scr.shape, jnp.float32)
        acc_scr[...] = jnp.zeros(acc_scr.shape, jnp.float32)

    q = q_ref[...]   # (bb, tq, D), input dtype (bf16 stays bf16)
    k = k_ref[...]   # (bb, tk, D)
    v = v_ref[...]   # (bb, tk, D)

    # Fold 1/sqrt(d_k) into the resident q tile: tq*D mults instead of tq*tk
    # on the scores.  (Re-executed per kv step; only matters if the VALU slot
    # binds in the small-D regime -- left as is per review.)
    q = q * jnp.asarray(scale, dtype=q.dtype)

    # scores[b, i, j] = sum_d q[b, i, d] * k[b, j, d]   (no materialized k^T)
    s = jax.lax.dot_general(
        q, k,
        dimension_numbers=(((2,), (2,)), ((0,), (0,))),
        preferred_element_type=jnp.float32)                 # (bb, tq, tk) f32

    if needs_mask:
        def _mask_cols(x):
            col = kv * block_k + jax.lax.broadcasted_iota(jnp.int32, x.shape, 2)
            return jnp.where(col < seq_len, x, -1e30)

        # Only trailing kv tiles can contain padded columns; skip the
        # iota + compare + select on every other kv step.
        s = jax.lax.cond((kv + 1) * block_k > seq_len, _mask_cols,
                         lambda x: x, s)

    # Online softmax update (all softmax math in f32).
    # (If EUP-bound on v6e/v7x with small D, exp in bf16 is ~2x cheaper and
    #  removes the p cast below; kept in f32 here for accuracy.)
    m_prev = m_scr[...]
    m_new = jnp.maximum(m_prev, jnp.max(s, axis=-1, keepdims=True))
    alpha = jnp.exp(m_prev - m_new)
    p = jnp.exp(s - m_new)                                  # (bb, tq, tk) f32

    l_scr[...] = alpha * l_scr[...] + jnp.sum(p, axis=-1, keepdims=True)
    pv = jax.lax.dot_general(
        p.astype(v.dtype), v,                               # bf16 MXU path
        dimension_numbers=(((2,), (1,)), ((0,), (0,))),
        preferred_element_type=jnp.float32)                 # (bb, tq, D) f32
    acc_scr[...] = alpha * acc_scr[...] + pv
    m_scr[...] = m_new

    @pl.when(kv == pl.num_programs(2) - 1)
    def _finalize():
        l = l_scr[...]
        if approx_reciprocal:
            inv_l = pl.reciprocal(l, approx=True)           # EUP slot, ~free
        else:
            inv_l = 1.0 / l
        o_ref[...] = (acc_scr[...] * inv_l).astype(o_ref.dtype)


def self_attention(q, k, v, *, d_k=None, e=1e-12,
                   block_q=None, block_k=None, batch_block=None,
                   vmem_limit_bytes=None, kv_buffers=None,
                   approx_reciprocal=True):
    """Flash-style scaled dot-product self-attention.

    Args:
      q, k, v: (batch, seq_len, d_model) arrays (same dtype).
      d_k: key dim for the 1/sqrt(d_k) scale (defaults to d_model, matching
           SelfAttention(d_model, d_model, d_model)).
      e: the PyTorch module adds e before softmax; it is an additive constant
         and therefore softmax-invariant, so it is dropped here.
      block_q / block_k: override the auto tile selection (auto: block_q up to
         512, block_k 256 on v6e/v7x and 128 on v5e, shrunk to fit the
         per-generation VMEM budget).
      batch_block: batch elements processed per grid step.
      vmem_limit_bytes: override the automatically chosen scoped-VMEM limit.
      kv_buffers: pipeline depth for the K/V stream (pl.Buffered); default 2.
      approx_reciprocal: use the EUP approximate reciprocal at finalize.
    Returns:
      (batch, seq_len, d_model) output in the input dtype.
    """
    del e  # additive constant before softmax -> softmax-invariant (no-op)
    B, S, D = q.shape
    assert k.shape == (B, S, D) and v.shape == (B, S, D)
    if d_k is None:
        d_k = D
    scale = float(d_k) ** -0.5

    itemsize = q.dtype.itemsize
    gran = max(8, 32 // itemsize)            # native sublane tile: 8/16/32
    kind = _device_kind()
    is_v7 = "v7" in kind
    budget, default_block_k = _vmem_budget_and_block_k(kind)
    kv_buf = 2 if kv_buffers is None else int(kv_buffers)

    # --- tile selection -----------------------------------------------------
    auto = (block_q is None and block_k is None)
    needs_mask = False
    if auto:
        # K/V are re-streamed from HBM once per q tile (kv is the innermost
        # grid axis), so go as deep on block_q as the VMEM budget allows.
        target_q, target_k = 512, default_block_k
        S_r = _round_up(S, gran)
        bb_guess = B if (S_r * D) <= (128 * 128) else 1
        while target_q > 128 and _vmem_estimate(
                bb_guess, min(target_q, S_r), min(target_k, S_r),
                D, itemsize, kv_buf) > budget:
            target_q //= 2
        while target_k > 128 and _vmem_estimate(
                bb_guess, min(target_q, S_r), min(target_k, S_r),
                D, itemsize, kv_buf) > budget:
            target_k //= 2
        target_k = min(target_k, target_q)

        # Prefer tiles that divide S exactly: no wrapper-side jnp.pad (3 extra
        # HBM read+write passes) and no in-kernel mask work at all.
        tq = _divisor_block(S, target_q, gran) or _divisor_block(S, target_q, 8)
        tk = _divisor_block(S, target_k, gran) or _divisor_block(S, target_k, 8)
        if tq is not None and tk is not None:
            S_pad = S
        else:
            # Fallback: pad to a kv-tile boundary, mask padded columns in-kernel.
            tk = target_k
            S_pad = _round_up(S, tk)
            tq = _divisor_block(S_pad, target_q, tk)
            needs_mask = True
    else:
        tq = block_q if block_q is not None else 512
        tk = block_k if block_k is not None else default_block_k
        tq = min(tq, _round_up(S, 8))
        tk = min(tk, _round_up(S, 8))
        S_pad = _round_up(_round_up(S, tq), tk)
        needs_mask = (S_pad != S)

    if needs_mask:
        pad = [(0, 0), (0, S_pad - S), (0, 0)]
        q = jnp.pad(q, pad)
        k = jnp.pad(k, pad)
        v = jnp.pad(v, pad)

    # --- batch blocking -------------------------------------------------------
    if batch_block is None:
        # Tiny problems: pack the batch per grid step to amortize the ~0.35us
        # per-step overhead; big problems: one batch element per step.
        batch_block = B if (S_pad * D) <= (128 * 128) else 1
    batch_block = max(1, min(batch_block, B))
    if is_v7 and B >= 2 and (S_pad // tq) == 1 and (B // batch_block) < 2:
        # Megacore needs >=2 steps along a 'parallel' grid axis or one TC idles.
        batch_block = max(1, B // 2)
    while B % batch_block:
        batch_block -= 1
    bb = batch_block

    grid = (B // bb, S_pad // tq, S_pad // tk)

    if vmem_limit_bytes is None:
        est = _vmem_estimate(bb, tq, tk, D, itemsize, kv_buf)
        # Always set explicitly: v5e's scoped default is only 16 MiB; v7x must
        # stay under 64 MiB physical (budget already caps at 48 MiB there).
        vmem_limit_bytes = int(min(budget, max(2 * est, 32 * (1 << 20))))

    kernel = functools.partial(
        _flash_attention_kernel,
        scale=scale, seq_len=S, block_k=tk, needs_mask=needs_mask,
        approx_reciprocal=approx_reciprocal)

    qo_spec = pl.BlockSpec((bb, tq, D), lambda b, qi, ki: (b, qi, 0))
    kv_index = lambda b, qi, ki: (b, ki, 0)
    if kv_buffers is not None and kv_buf != 2:
        # Deeper K/V stream if the kernel is still DMA-exposed after tile growth.
        kv_spec = pl.BlockSpec((bb, tk, D), kv_index,
                               pipeline_mode=pl.Buffered(kv_buf))
    else:
        kv_spec = pl.BlockSpec((bb, tk, D), kv_index)

    # NOTE: for d_model < 128 the output block's last dim underfills the lanes
    # (masked partial vst) and both matmuls underfill the MXU; if production
    # d_model < 128, fold heads/batch rows into the lane dim before calling.
    out = pl.pallas_call(
        kernel,
        out_shape=jax.ShapeDtypeStruct((B, S_pad, D), q.dtype),
        grid_spec=pltpu.PrefetchScalarGridSpec(
            num_scalar_prefetch=0,
            grid=grid,
            in_specs=[qo_spec, kv_spec, kv_spec],
            out_specs=qo_spec,
            scratch_shapes=[
                pltpu.VMEM((bb, tq, 1), jnp.float32),   # m (running max)
                pltpu.VMEM((bb, tq, 1), jnp.float32),   # l (running sum)
                pltpu.VMEM((bb, tq, D), jnp.float32),   # acc
            ],
        ),
        compiler_params=pltpu.CompilerParams(
            dimension_semantics=("parallel", "parallel", "arbitrary"),
            vmem_limit_bytes=vmem_limit_bytes,
        ),
    )(q, k, v)

    if needs_mask:
        out = out[:, :S, :]
    return out


def _reference(q, k, v, *, d_k, e=1e-12):
    scale = float(d_k) ** -0.5
    x = jnp.einsum("bqd,bkd->bqk",
                   q.astype(jnp.float32), k.astype(jnp.float32)) * scale + e
    x = jax.nn.softmax(x, axis=-1)
    return jnp.einsum("bqk,bkd->bqd", x, v.astype(jnp.float32)).astype(q.dtype)


if __name__ == "__main__":
    key = jax.random.PRNGKey(0)

    # --- Case 1: module-sized example (batch=2, seq=8, d_model=32) ----------
    B, S, D = 2, 8, 32
    rq, rk, rv, key = jax.random.split(key, 4)
    q = jax.random.normal(rq, (B, S, D), dtype=jnp.float32)
    k = jax.random.normal(rk, (B, S, D), dtype=jnp.float32)
    v = jax.random.normal(rv, (B, S, D), dtype=jnp.float32)

    out = jax.block_until_ready(self_attention(q, k, v, d_k=D))
    ref = _reference(q, k, v, d_k=D)
    assert out.shape == (B, S, D)
    err1 = jnp.max(jnp.abs(out - ref))
    assert jnp.allclose(out, ref, atol=2e-3, rtol=2e-3), f"case1 err = {err1}"

    # --- Case 2: long sequence -> multi-kv-tile online softmax, no padding --
    B2, S2, D2 = 2, 1024, 32
    rq, rk, rv, key = jax.random.split(key, 4)
    q2 = jax.random.normal(rq, (B2, S2, D2), dtype=jnp.float32)
    k2 = jax.random.normal(rk, (B2, S2, D2), dtype=jnp.float32)
    v2 = jax.random.normal(rv, (B2, S2, D2), dtype=jnp.float32)

    out2 = jax.block_until_ready(self_attention(q2, k2, v2, d_k=D2))
    ref2 = _reference(q2, k2, v2, d_k=D2)
    assert out2.shape == (B2, S2, D2)
    err2 = jnp.max(jnp.abs(out2 - ref2))
    assert jnp.allclose(out2, ref2, atol=2e-3, rtol=2e-3), f"case2 err = {err2}"

    # --- Case 3: ragged S + forced small tiles -> padding + gated kv mask ---
    B3, S3, D3 = 2, 200, 32
    rq, rk, rv, key = jax.random.split(key, 4)
    q3 = jax.random.normal(rq, (B3, S3, D3), dtype=jnp.float32)
    k3 = jax.random.normal(rk, (B3, S3, D3), dtype=jnp.float32)
    v3 = jax.random.normal(rv, (B3, S3, D3), dtype=jnp.float32)

    out3 = jax.block_until_ready(
        self_attention(q3, k3, v3, d_k=D3, block_q=64, block_k=64))
    ref3 = _reference(q3, k3, v3, d_k=D3)
    assert out3.shape == (B3, S3, D3)
    err3 = jnp.max(jnp.abs(out3 - ref3))
    assert jnp.allclose(out3, ref3, atol=2e-3, rtol=2e-3), f"case3 err = {err3}"

    print("KERNEL_OK")
</pallas_src>

<mosaic_0001>
module attributes {stable_mosaic.version = 11 : i64} {
  func.func @_flash_attention_kernel(%arg0: i32, %arg1: i32, %arg2: i32, %arg3: memref<2x8x32xf32, #tpu.memory_space<vmem>>, %arg4: memref<2x8x32xf32, #tpu.memory_space<vmem>>, %arg5: memref<2x8x32xf32, #tpu.memory_space<vmem>>, %arg6: memref<2x8x32xf32, #tpu.memory_space<vmem>>, %arg7: memref<2x8x1xf32, #tpu.memory_space<vmem>>, %arg8: memref<2x8x1xf32, #tpu.memory_space<vmem>>, %arg9: memref<2x8x32xf32, #tpu.memory_space<vmem>>) attributes {dimension_semantics = [#tpu.dimension_semantics<parallel>, #tpu.dimension_semantics<parallel>, #tpu.dimension_semantics<arbitrary>], iteration_bounds = array<i64: 1, 1, 1>, scalar_prefetch = 0 : i64, scratch_operands = 3 : i64, tpu.core_type = #tpu.core_type<tc>, window_params = [{transform_indices = @transform_0, window_bounds = array<i64: 2, 8, 32>}, {transform_indices = @transform_1, window_bounds = array<i64: 2, 8, 32>}, {transform_indices = @transform_2, window_bounds = array<i64: 2, 8, 32>}, {transform_indices = @transform_3, window_bounds = array<i64: 2, 8, 32>}]} {
    %c0_i32 = arith.constant 0 : i32
    %0 = arith.cmpi eq, %arg2, %c0_i32 : i32
    %1 = arith.extui %0 : i1 to i32
    %c0_i32_0 = arith.constant 0 : i32
    %2 = arith.cmpi ne, %1, %c0_i32_0 : i32
    scf.if %2 {
      %cst_33 = arith.constant 0xFF800000 : f32
      %34 = vector.broadcast %cst_33 : f32 to vector<2x8x1xf32>
      %c0_34 = arith.constant 0 : index
      %c0_35 = arith.constant 0 : index
      %c0_36 = arith.constant 0 : index
      %35 = vector.load %arg7[%c0_34, %c0_35, %c0_36] : memref<2x8x1xf32, #tpu.memory_space<vmem>>, vector<2x8x1xf32>
      tpu.vector_store %arg7[%c0_34, %c0_35, %c0_36], %34 {strides = array<i32>} : memref<2x8x1xf32, #tpu.memory_space<vmem>>, vector<2x8x1xf32>,
      %cst_37 = arith.constant 0.000000e+00 : f32
      %36 = vector.broadcast %cst_37 : f32 to vector<2x8x1xf32>
      %c0_38 = arith.constant 0 : index
      %c0_39 = arith.constant 0 : index
      %c0_40 = arith.constant 0 : index
      %37 = vector.load %arg8[%c0_38, %c0_39, %c0_40] : memref<2x8x1xf32, #tpu.memory_space<vmem>>, vector<2x8x1xf32>
      tpu.vector_store %arg8[%c0_38, %c0_39, %c0_40], %36 {strides = array<i32>} : memref<2x8x1xf32, #tpu.memory_space<vmem>>, vector<2x8x1xf32>,
      %cst_41 = arith.constant 0.000000e+00 : f32
      %38 = vector.broadcast %cst_41 : f32 to vector<2x8x32xf32>
      %c0_42 = arith.constant 0 : index
      %c0_43 = arith.constant 0 : index
      %c0_44 = arith.constant 0 : index
      %39 = vector.load %arg9[%c0_42, %c0_43, %c0_44] : memref<2x8x32xf32, #tpu.memory_space<vmem>>, vector<2x8x32xf32>
      tpu.vector_store %arg9[%c0_42, %c0_43, %c0_44], %38 {strides = array<i32>} : memref<2x8x32xf32, #tpu.memory_space<vmem>>, vector<2x8x32xf32>,
    } else {
    }
    %c0 = arith.constant 0 : index
    %c0_1 = arith.constant 0 : index
    %c0_2 = arith.constant 0 : index
    %3 = vector.load %arg3[%c0, %c0_1, %c0_2] : memref<2x8x32xf32, #tpu.memory_space<vmem>>, vector<2x8x32xf32>
    %c0_3 = arith.constant 0 : index
    %c0_4 = arith.constant 0 : index
    %c0_5 = arith.constant 0 : index
    %4 = vector.load %arg4[%c0_3, %c0_4, %c0_5] : memref<2x8x32xf32, #tpu.memory_space<vmem>>, vector<2x8x32xf32>
    %c0_6 = arith.constant 0 : index
    %c0_7 = arith.constant 0 : index
    %c0_8 = arith.constant 0 : index
    %5 = vector.load %arg5[%c0_6, %c0_7, %c0_8] : memref<2x8x32xf32, #tpu.memory_space<vmem>>, vector<2x8x32xf32>
    %cst = arith.constant 0.176776692 : f32
    %6 = vector.broadcast %cst : f32 to vector<2x8x32xf32>
    %7 = arith.mulf %3, %6 : vector<2x8x32xf32>
    %cst_9 = arith.constant dense<0.000000e+00> : vector<2x8x8xf32>
    %8 = tpu.matmul %7, %4, %cst_9 {dimension_numbers = #tpu.dot_dimension_numbers<[2], [2], [1], [1], [0, 0, 0, 1, 1, 1], [0], [0]>} : vector<2x8x32xf32>, vector<2x8x32xf32>, vector<2x8x8xf32> -> vector<2x8x8xf32>
    %c0_10 = arith.constant 0 : index
    %c0_11 = arith.constant 0 : index
    %c0_12 = arith.constant 0 : index
    %9 = vector.load %arg7[%c0_10, %c0_11, %c0_12] : memref<2x8x1xf32, #tpu.memory_space<vmem>>, vector<2x8x1xf32>
    %cst_13 = arith.constant dense<0xFF800000> : vector<2x8xf32>
    %10 = vector.multi_reduction <maximumf>, %8, %cst_13 [2] : vector<2x8x8xf32> to vector<2x8xf32>
    %11 = vector.shape_cast %10 : vector<2x8xf32> to vector<2x8x1xf32>
    %12 = arith.maximumf %9, %11 : vector<2x8x1xf32>
    %13 = arith.subf %9, %12 : vector<2x8x1xf32>
    %14 = math.exp %13 : vector<2x8x1xf32>
    %15 = vector.broadcast %12 : vector<2x8x1xf32> to vector<2x8x8xf32>
    %16 = arith.subf %8, %15 : vector<2x8x8xf32>
    %17 = math.exp %16 : vector<2x8x8xf32>
    %c0_14 = arith.constant 0 : index
    %c0_15 = arith.constant 0 : index
    %c0_16 = arith.constant 0 : index
    %18 = vector.load %arg8[%c0_14, %c0_15, %c0_16] : memref<2x8x1xf32, #tpu.memory_space<vmem>>, vector<2x8x1xf32>
    %19 = arith.mulf %14, %18 : vector<2x8x1xf32>
    %cst_17 = arith.constant dense<0.000000e+00> : vector<2x8xf32>
    %20 = vector.multi_reduction <add>, %17, %cst_17 [2] : vector<2x8x8xf32> to vector<2x8xf32>
    %21 = vector.shape_cast %20 : vector<2x8xf32> to vector<2x8x1xf32>
    %22 = arith.addf %19, %21 : vector<2x8x1xf32>
    %c0_18 = arith.constant 0 : index
    %c0_19 = arith.constant 0 : index
    %c0_20 = arith.constant 0 : index
    %23 = vector.load %arg8[%c0_18, %c0_19, %c0_20] : memref<2x8x1xf32, #tpu.memory_space<vmem>>, vector<2x8x1xf32>
    tpu.vector_store %arg8[%c0_18, %c0_19, %c0_20], %22 {strides = array<i32>} : memref<2x8x1xf32, #tpu.memory_space<vmem>>, vector<2x8x1xf32>,
    %cst_21 = arith.constant dense<0.000000e+00> : vector<2x8x32xf32>
    %24 = tpu.matmul %17, %5, %cst_21 {dimension_numbers = #tpu.dot_dimension_numbers<[2], [1], [1], [2], [0, 0, 0, 1, 1, 2], [0], [0]>} : vector<2x8x8xf32>, vector<2x8x32xf32>, vector<2x8x32xf32> -> vector<2x8x32xf32>
    %c0_22 = arith.constant 0 : index
    %c0_23 = arith.constant 0 : index
    %c0_24 = arith.constant 0 : index
    %25 = vector.load %arg9[%c0_22, %c0_23, %c0_24] : memref<2x8x32xf32, #tpu.memory_space<vmem>>, vector<2x8x32xf32>
    %26 = vector.broadcast %14 : vector<2x8x1xf32> to vector<2x8x32xf32>
    %27 = arith.mulf %26, %25 : vector<2x8x32xf32>
    %28 = arith.addf %27, %24 : vector<2x8x32xf32>
    %c0_25 = arith.constant 0 : index
    %c0_26 = arith.constant 0 : index
    %c0_27 = arith.constant 0 : index
    %29 = vector.load %arg9[%c0_25, %c0_26, %c0_27] : memref<2x8x32xf32, #tpu.memory_space<vmem>>, vector<2x8x32xf32>
    tpu.vector_store %arg9[%c0_25, %c0_26, %c0_27], %28 {strides = array<i32>} : memref<2x8x32xf32, #tpu.memory_space<vmem>>, vector<2x8x32xf32>,
    %c0_28 = arith.constant 0 : index
    %c0_29 = arith.constant 0 : index
    %c0_30 = arith.constant 0 : index
    %30 = vector.load %arg7[%c0_28, %c0_29, %c0_30] : memref<2x8x1xf32, #tpu.memory_space<vmem>>, vector<2x8x1xf32>
    tpu.vector_store %arg7[%c0_28, %c0_29, %c0_30], %12 {strides = array<i32>} : memref<2x8x1xf32, #tpu.memory_space<vmem>>, vector<2x8x1xf32>,
    %c0_i32_31 = arith.constant 0 : i32
    %31 = arith.cmpi eq, %arg2, %c0_i32_31 : i32
    %32 = arith.extui %31 : i1 to i32
    %c0_i32_32 = arith.constant 0 : i32
    %33 = arith.cmpi ne, %32, %c0_i32_32 : i32
    scf.if %33 {
      %c0_33 = arith.constant 0 : index
      %c0_34 = arith.constant 0 : index
      %c0_35 = arith.constant 0 : index
      %34 = vector.load %arg8[%c0_33, %c0_34, %c0_35] : memref<2x8x1xf32, #tpu.memory_space<vmem>>, vector<2x8x1xf32>
      %35 = tpu.reciprocal %34 {approx = true} : vector<2x8x1xf32> -> vector<2x8x1xf32>
      %c0_36 = arith.constant 0 : index
      %c0_37 = arith.constant 0 : index
      %c0_38 = arith.constant 0 : index
      %36 = vector.load %arg9[%c0_36, %c0_37, %c0_38] : memref<2x8x32xf32, #tpu.memory_space<vmem>>, vector<2x8x32xf32>
      %37 = vector.broadcast %35 : vector<2x8x1xf32> to vector<2x8x32xf32>
      %38 = arith.mulf %36, %37 : vector<2x8x32xf32>
      %c0_39 = arith.constant 0 : index
      %c0_40 = arith.constant 0 : index
      %c0_41 = arith.constant 0 : index
      %39 = vector.load %arg6[%c0_39, %c0_40, %c0_41] : memref<2x8x32xf32, #tpu.memory_space<vmem>>, vector<2x8x32xf32>
      tpu.vector_store %arg6[%c0_39, %c0_40, %c0_41], %38 {strides = array<i32>} : memref<2x8x32xf32, #tpu.memory_space<vmem>>, vector<2x8x32xf32>,
    } else {
    }
    return
  }
  func.func @transform_0(%arg0: i32, %arg1: i32, %arg2: i32) -> (i32, i32, i32) {
    %c0_i32 = arith.constant 0 : i32
    %c0_i32_0 = arith.constant 0 : i32
    return %arg0, %arg1, %c0_i32 : i32, i32, i32
  }
  func.func @transform_1(%arg0: i32, %arg1: i32, %arg2: i32) -> (i32, i32, i32) {
    %c0_i32 = arith.constant 0 : i32
    %c0_i32_0 = arith.constant 0 : i32
    return %arg0, %arg2, %c0_i32 : i32, i32, i32
  }
  func.func @transform_2(%arg0: i32, %arg1: i32, %arg2: i32) -> (i32, i32, i32) {
    %c0_i32 = arith.constant 0 : i32
    %c0_i32_0 = arith.constant 0 : i32
    return %arg0, %arg2, %c0_i32 : i32, i32, i32
  }
  func.func @transform_3(%arg0: i32, %arg1: i32, %arg2: i32) -> (i32, i32, i32) {
    %c0_i32 = arith.constant 0 : i32
    %c0_i32_0 = arith.constant 0 : i32
    return %arg0, %arg1, %c0_i32 : i32, i32, i32
  }
}

</mosaic_0001>

<bundles_post_ra>
// kernel: tpu_custom_call.1
= control target key start
LH: loop header
LB: loop body
LE: loop exit
PB: predicated region body
PF: predicated region fallthrough
CT: control target
= control target key end

     0   :  { %8 = vsyncpa [#allocation6], 0  ;;  %s710_s0 = inlined_call_operand.hbm [shape: f32[2,8,32], index: 0, kind: input, shape index: {}]   ;;  %s711_s1 = inlined_call_operand.hbm [shape: f32[2,8,32], index: 1, kind: input, shape index: {}]   ;;  %s712_s2 = inlined_call_operand.hbm [shape: f32[2,8,32], index: 2, kind: input, shape index: {}]   ;;  %s713_s3 = inlined_call_operand.hbm [shape: f32[2,8,32], index: 3, kind: output, shape index: {}]  }
   0x1   :  { %9 = vsyncpa [#allocation9], 0 }
   0x2   :  { %10 = vsyncpa [#allocation7], 0  ;;  %s628_s12 = smov [#allocation8]   ;;  %s629_s14 = smov [#allocation5]  }
   0x3   :  { %s28_s13 = sshll.u32 %s628_s12, 4  ;;  %s16_s15 = sshll.u32 %s629_s14, 4  ;;  %s29_s13 = int_to_ptr.vmem [resolvable:$true] %s28_s13  ;;  %s17_s15 = int_to_ptr.vmem [resolvable:$true] %s16_s15 }
   0x4   :  { %s550_s16 = scalar_lea.vmem %s29_s13, 256  ;;  %p555_p1 = scmp.lt.s32.totalorder %s29_s13, %s29_s13 }
   0x5   :  { %p551_p0 = scmp.ne.s32.totalorder %s29_s13, %s550_s16  ;;  %p556_p2 = scmp.lt.s32.totalorder %s550_s16, %s550_s16 }
   0x7   :  { %p557_p3 = por %p556_p2, %p555_p1 }
   0x9   :  { %p558_p4 = pnand %p557_p3, %p551_p0 }
   0xb   :  { %561 = shalt.err (!%p558_p4)
}
   0xc   :  { %s630_s17 = smov 128   ;;  %s631_s18 = smov 8  }
   0xd   :  { %34 = dma.hbm_to_vmem [thread:$0]  %s711_s1, 256, %s29_s13, [#allocation9], %s630_s17, %s630_s17, %s631_s18  }
   0xe   :  { %s570_s21 = scalar_lea.vmem %s17_s15, 256  ;;  %p575_p6 = scmp.lt.s32.totalorder %s17_s15, %s17_s15 }
   0xf   :  { %p571_p5 = scmp.ne.s32.totalorder %s17_s15, %s570_s21  ;;  %p576_p7 = scmp.lt.s32.totalorder %s570_s21, %s570_s21 }
  0x11   :  { %p577_p8 = por %p576_p7, %p575_p6 }
  0x13   :  { %p578_p9 = pnand %p577_p8, %p571_p5 }
  0x15   :  { %581 = shalt.err (!%p578_p9)
}
  0x16   :  { %22 = dma.hbm_to_vmem [thread:$0]  %s710_s0, 256, %s17_s15, [#allocation6], %s630_s17, %s630_s17, %s631_s18  }
  0x17   :  { %s632_s24 = smov [#allocation10]  }
  0x18   :  { %s40_s25 = sshll.u32 %s632_s24, 4  ;;  %s41_s25 = int_to_ptr.vmem [resolvable:$true] %s40_s25 }
  0x19   :  { %s590_s26 = scalar_lea.vmem %s41_s25, 256  ;;  %p595_p11 = scmp.lt.s32.totalorder %s41_s25, %s41_s25 }
  0x1a   :  { %p591_p10 = scmp.ne.s32.totalorder %s41_s25, %s590_s26  ;;  %p596_p12 = scmp.lt.s32.totalorder %s590_s26, %s590_s26 }
  0x1c   :  { %p597_p13 = por %p596_p12, %p595_p11 }
  0x1e   :  { %p598_p0 = pnand %p597_p13, %p591_p10 }
  0x20   :  { %601 = shalt.err (!%p598_p0)
}
  0x21   :  { %46 = dma.hbm_to_vmem [thread:$0]  %s712_s2, 256, %s41_s25, [#allocation9], %s630_s17, %s630_s17, %s631_s18  }
  0x22   :  { %622 = dma.done.wait [#allocation6], 256  }
  0x23   :  { %623 = vsyncadd [#allocation6], 4294967040 }
  0x24   :  { %624 = dma.done.wait [#allocation9], 512  }
  0x25   :  { %625 = vsyncadd [#allocation9], 4294966784  ;;  %vm65_vm0 = vcmask 261120   ;;  %v633_v0 = vmov 0.0   ;;  %vm634_vm1 = vmmov 0   ;;  %v70_v1 = vld [vmem:[#allocation8] sm:$0xff] }
  0x26   :  { %498 = vmatprep.subr.mxu0 %v633_v0  ;;  %66 = vst.msk [vmem:[#allocation4] sm:$0xff] %vm65_vm0, %v633_v0  ;;  %67 = vst.msk [vmem:[#allocation4 + $0x8] sm:$0xff] %vm65_vm0, %v633_v0  ;;  %503 = vmatprep.subr.mxu1 %v633_v0  ;;  %v71_v2 = vld [vmem:[#allocation8 + $0x8] sm:$0xff]  ;;  %v68_v3 = vld [vmem:[#allocation5] sm:$0xff]  ;;  %vm60_vm2 = vcmask 7168   ;;  %v635_v7 = vmov -inf  }
  0x27   :  { %500 = vmatprep.mubr.msk.f32.mxu0 %vm634_vm1, %v633_v0  ;;  %505 = vmatprep.mubr.msk.f32.mxu1 %vm634_vm1, %v633_v0  ;;  %v74_v4 = vmul.f32 0.17677669, %v68_v3  ;;  %v69_v5 = vld [vmem:[#allocation5 + $0x8] sm:$0xff]  ;;  %61 = vst.msk [vmem:[#allocation2] sm:$0xff] %vm60_vm2, %v635_v7  ;;  %62 = vst.msk [vmem:[#allocation2 + $0x8] sm:$0xff] %vm60_vm2, %v635_v7  ;;  %vm231_vm3 = vcmask 64512  }
  0x28   :  { %499 = vmatpush3.xpose.msk.msra.mxu0 %vm65_vm0, %v70_v1  ;;  %504 = vmatpush3.xpose.msk.msra.mxu1 %vm65_vm0, %v71_v2  ;;  %v75_v6 = vmul.f32 0.17677669, %v69_v5  ;;  %63 = vst.msk [vmem:[#allocation3] sm:$0xff] %vm60_vm2, %v633_v0  ;;  %64 = vst.msk [vmem:[#allocation3 + $0x8] sm:$0xff] %vm60_vm2, %v633_v0  ;;  %v636_v14 = vmov 0   ;;  %v72_v23 = vld [vmem:[#allocation10] sm:$0xff] }
  0x29   :  { %508 = vmatprep.subr.mxu0 %v633_v0  ;;  %513 = vmatprep.subr.mxu1 %v633_v0  ;;  %v73_v24 = vld [vmem:[#allocation10 + $0x8] sm:$0xff]  ;;  %s637_s0 = smov [#allocation11]  }
  0x2a   :  { %528 = vset.pattern.permute.xlu1 %v636_v14  ;;  %529 = vset.pattern.permute.xlu0 %v636_v14  ;;  %s471_s2 = sshll.u32 %s637_s0, 4  ;;  %s472_s2 = int_to_ptr.vmem [resolvable:$true] %s471_s2 }
  0x2b   :  { %501 = vmatmul.mubr.msk.f32.vlgmr.msra.gmra.mxu0 %vm65_vm0, %v74_v4  ;;  %506 = vmatmul.mubr.msk.f32.vlgmr.msra.gmra.mxu1 %vm65_vm0, %v75_v6  ;;  %s602_s28 = scalar_lea.vmem %s472_s2, 256  ;;  %p607_p2 = scmp.lt.s32.totalorder %s472_s2, %s472_s2 }
  0x2c   :  { %510 = vmatprep.mubr.msk.f32.mxu0 %vm634_vm1, %v633_v0  ;;  %515 = vmatprep.mubr.msk.f32.mxu1 %vm634_vm1, %v633_v0  ;;  %p603_p1 = scmp.ne.s32.totalorder %s472_s2, %s602_s28  ;;  %p608_p3 = scmp.lt.s32.totalorder %s602_s28, %s602_s28 }
  0x2d   :  { %509 = vmatpush3.msra.mxu0 %v72_v23  ;;  %514 = vmatpush3.msra.mxu1 %v73_v24  ;;  %v423_v51 = vld [vmem:[#allocation4] sm:$0xff]  ;;  %v424_v54 = vld [vmem:[#allocation4 + $0x8] sm:$0xff] }
  0x2e   :  { %v229_v15 = vld [vmem:[#allocation2] sm:$0xff]  ;;  %v230_v18 = vld [vmem:[#allocation2 + $0x8] sm:$0xff]  ;;  %p609_p4 = por %p608_p3, %p607_p2 }
  0x2f   :  { %v262_v39 = vld [vmem:[#allocation3] sm:$0xff]  ;;  %v263_v42 = vld [vmem:[#allocation3 + $0x8] sm:$0xff] }
  0x30   :  { %p610_p5 = pnand %p609_p4, %p603_p1 }
  0xeb   :  { %v149_v8 = vpop.f32.mrf.mxu0  ;;  %v225_v9 = vpop.f32.mrf.mxu1 }
  0xec   :  { %v232_v10 = vsel %vm231_vm3, %v149_v8, -inf  ;;  %v235_v13 = vsel %vm231_vm3, %v225_v9, -inf }
  0xed   :  { %233 = vmax.xlane.f32.xlu0 %v232_v10  ;;  %v502_v11 = vpop.f32.mrf.mxu0  ;;  %v507_v12 = vpop.f32.mrf.mxu1 }
  0xf1   :  { %236 = vmax.xlane.f32.xlu0 %v235_v13 }
 0x176   :  { %v234_v16 = vpop.xlane.xlu0 %233 }
 0x177   :  { %v238_v17 = vmax.f32 %v229_v15, %v234_v16 }
 0x179   :  { %v240_v19 = vsub.f32 %v229_v15, %v238_v17  ;;  %441 = vst.msk [vmem:[#allocation2] sm:$0xff] %vm60_vm2, %v238_v17  ;;  %248 = vperm.xlu1 %528, %v238_v17  }
 0x17a   :  { %v237_v20 = vpop.xlane.xlu0 %236 }
 0x17b   :  { %v239_v21 = vmax.f32 %v230_v18, %v237_v20  ;;  %v242_v36 = vmul.f32 1.442695, %v240_v19 }
 0x17d   :  { %v241_v22 = vsub.f32 %v230_v18, %v239_v21  ;;  %442 = vst.msk [vmem:[#allocation2 + $0x8] sm:$0xff] %vm60_vm2, %v239_v21  ;;  %253 = vperm.xlu1 %528, %v239_v21  }
 0x17f   :  { %v244_v34 = vmul.f32 1.442695, %v241_v22 }
 0x1f4   :  { %v249_v25 = vpop.permute.xlu1 %248 }
 0x1f5   :  { %v256_v26 = vsub.f32 %v149_v8, %v249_v25 }
 0x1f7   :  { %v258_v27 = vmul.f32 1.442695, %v256_v26 }
 0x1f8   :  { %v254_v28 = vpop.permute.xlu1 %253 }
 0x1f9   :  { %530 = vpow2.f32 %v258_v27  ;;  %v257_v29 = vsub.f32 %v225_v9, %v254_v28 }
 0x1fb   :  { %v260_v30 = vmul.f32 1.442695, %v257_v29 }
 0x1fd   :  { %532 = vpow2.f32 %v260_v30 }
 0x1fe   :  { %534 = vpow2.f32 %v244_v34 }
 0x1ff   :  { %536 = vpow2.f32 %v242_v36 }
 0x206   :  { %v531_v31 = vpop.eup %530 }
 0x207   :  { %511 = vmatmul.mubr.msk.f32.vlgmr.msra.gmra.mxu0 %vm231_vm3, %v531_v31  ;;  %v266_v32 = vsel %vm231_vm3, %v531_v31, 0.0 }
 0x208   :  { %267 = vadd.xlane.f32.xlu0 %v266_v32 }
 0x20a   :  { %v533_v33 = vpop.eup %532 }
 0x20b   :  { %516 = vmatmul.mubr.msk.f32.vlgmr.msra.gmra.mxu1 %vm231_vm3, %v533_v33  ;;  %v269_v35 = vsel %vm231_vm3, %v533_v33, 0.0  ;;  %v535_v37 = vpop.eup %534 }
 0x20c   :  { %270 = vadd.xlane.f32.xlu1 %v269_v35  ;;  %v537_v38 = vpop.eup %536  ;;  %v265_v44 = vmul.f32 %v535_v37, %v263_v42 }
 0x20d   :  { %v264_v40 = vmul.f32 %v537_v38, %v262_v39 }
 0x21d   :  { %432 = vperm.xlu1 %528, %v535_v37  }
 0x21e   :  { %427 = vperm.xlu0 %529, %v537_v38  }
 0x291   :  { %v268_v41 = vpop.xlane.xlu0 %267 }
 0x292   :  { %v272_v43 = vadd.f32 %v268_v41, %v264_v40 }
 0x294   :  { %275 = vst.msk [vmem:[#allocation3] sm:$0xff] %vm60_vm2, %v272_v43 }
 0x295   :  { %v271_v45 = vpop.xlane.xlu1 %270 }
 0x296   :  { %v273_v46 = vadd.f32 %v271_v45, %v265_v44 }
 0x298   :  { %276 = vst.msk [vmem:[#allocation3 + $0x8] sm:$0xff] %vm60_vm2, %v273_v46 }
 0x299   :  { %v428_v52 = vpop.permute.xlu0 %427  ;;  %v433_v55 = vpop.permute.xlu1 %432 }
 0x29a   :  { %v435_v53 = vmul.f32 %v428_v52, %v423_v51  ;;  %v436_v59 = vmul.f32 %v433_v55, %v424_v54 }
 0x29b   :  { %v446_v47 = vld [vmem:[#allocation3] sm:$0xff] }
 0x29c   :  { %538 = vrcp.f32 %v446_v47 }
 0x29f   :  { %v447_v48 = vld [vmem:[#allocation3 + $0x8] sm:$0xff] }
 0x2a0   :  { %540 = vrcp.f32 %v447_v48 }
 0x2a9   :  { %v539_v49 = vpop.eup %538 }
 0x2aa   :  { %454 = vperm.xlu0 %529, %v539_v49  }
 0x2ad   :  { %v541_v50 = vpop.eup %540 }
 0x2ae   :  { %459 = vperm.xlu0 %529, %v541_v50  }
 0x2c7   :  { %v346_v56 = vpop.f32.mrf.mxu0 }
 0x2c8   :  { %v437_v57 = vadd.f32 %v435_v53, %v346_v56 }
 0x2c9   :  { %v512_v58 = vpop.f32.mrf.mxu0 }
 0x2ca   :  { %439 = vst.msk [vmem:[#allocation4] sm:$0xff] %vm65_vm0, %v437_v57 }
 0x2cb   :  { %v419_v60 = vpop.f32.mrf.mxu1 }
 0x2cc   :  { %v438_v61 = vadd.f32 %v436_v59, %v419_v60 }
 0x2cd   :  { %v517_v62 = vpop.f32.mrf.mxu1 }
 0x2ce   :  { %440 = vst.msk [vmem:[#allocation4 + $0x8] sm:$0xff] %vm65_vm0, %v438_v61 }
 0x2d1   :  { %v450_v63 = vld [vmem:[#allocation4] sm:$0xff] }
 0x2d5   :  { %v451_v2 = vld [vmem:[#allocation4 + $0x8] sm:$0xff] }
 0x325   :  { %v455_v0 = vpop.permute.xlu0 %454 }
 0x326   :  { %v462_v1 = vmul.f32 %v455_v0, %v450_v63 }
 0x328   :  { %464 = vst.msk [vmem:[#allocation11] sm:$0xff] %vm65_vm0, %v462_v1 }
 0x329   :  { %v460_v3 = vpop.permute.xlu0 %459 }
 0x32a   :  { %v463_v4 = vmul.f32 %v460_v3, %v451_v2 }
 0x32c   :  { %465 = vst.msk [vmem:[#allocation11 + $0x8] sm:$0xff] %vm65_vm0, %v463_v4 }
 0x32d   :  { %613 = shalt.err (!%p610_p5)
}
 0x32e   :  { %477 = dma.vmem_to_hbm [thread:$0]  %s472_s2, 256, %s713_s3, [#allocation7], %s630_s17, %s630_s17, %s631_s18  }
 0x32f   :  { %626 = dma.done.wait [#allocation7], 256  }
 0x330   :  { %627 = vsyncadd [#allocation7], 4294967040 }
 0x331   :  { %481 = vsyncpa [#allocation6], 1 }
 0x332   :  { %482 = vsyncpa [#allocation9], 1 }
 0x333   :  { %483 = vsyncpa [#allocation7], 1 }

</bundles_post_ra>
